<compile_context>
chip_gen: v5e
topology: v5e:2x2
jax: 0.10.0
libtpu: 0.0.40
codegen_flags: <defaults>
</compile_context>

<pallas_src>
import functools

import jax
import jax.numpy as jnp
from jax.experimental import pallas as pl
from jax.experimental.pallas import tpu as pltpu


def _triplet_kernel(a_ref, p_ref, n_ref, loss_ref, *, margin):
    # a_ref/p_ref/n_ref: (TILE_B, D) VMEM tiles ; loss_ref: (TILE_B, 1) VMEM.
    # Finish the positive branch before touching n_ref so that at most ~3
    # full-tile f32 arrays are live at once (a, one diff, one fresh cast).
    a = a_ref[...].astype(jnp.float32)
    dp = a - p_ref[...].astype(jnp.float32)
    dist_p = jnp.sum(dp * dp, axis=1, keepdims=True)          # (TILE_B, 1)
    del dp
    dn = a - n_ref[...].astype(jnp.float32)
    dist_n = jnp.sum(dn * dn, axis=1, keepdims=True)           # (TILE_B, 1)
    loss_ref[...] = jnp.maximum(dist_p - dist_n + margin, 0.0)


def _round_up(x, m):
    return (x + m - 1) // m * m


def triplet_loss(anchor, positive, negative, margin, *, size_average=True,
                 max_tile_b=None, vmem_budget_bytes=32 * 1024 * 1024):
    """JAX/Pallas equivalent of TripletLoss(margin)(anchor, positive, negative)."""
    assert anchor.shape == positive.shape == negative.shape and anchor.ndim == 2
    b, d = anchor.shape
    in_itemsize = jnp.dtype(anchor.dtype).itemsize
    d_pad = _round_up(d, 128)  # VMEM pads the lane (last) dim to 128

    # Honest per-row VMEM footprint:
    #   3 inputs x 2 pipeline buffers, in the streamed (input) dtype
    #   ~3 full-tile f32 working arrays live at peak inside the kernel
    #   (TILE_B, 1) f32 output, lane-padded to 128, double buffered
    per_row_bytes = d_pad * (3 * 2 * in_itemsize + 3 * 4) + 2 * 128 * 4
    tile_cap = max(8, vmem_budget_bytes // per_row_bytes)
    tile_b = min(tile_cap, _round_up(b, 8))        # never bigger than the data
    if max_tile_b is not None:                     # test hook only; no default cap
        tile_b = min(tile_b, max_tile_b)
    tile_b = max(8, (tile_b // 8) * 8)             # multiple of 8 sublanes

    num_tiles = pl.cdiv(b, tile_b)                 # ragged last block is fine
    kernel = functools.partial(_triplet_kernel, margin=float(margin))

    losses = pl.pallas_call(
        kernel,
        grid=(num_tiles,),
        in_specs=[
            pl.BlockSpec((tile_b, d), lambda i: (i, 0)),   # anchor
            pl.BlockSpec((tile_b, d), lambda i: (i, 0)),   # positive
            pl.BlockSpec((tile_b, d), lambda i: (i, 0)),   # negative
        ],
        # Ragged tail rows only produce out-of-bounds output rows, which
        # Pallas drops — no wrapper-side padding / masking required.
        out_specs=pl.BlockSpec((tile_b, 1), lambda i: (i, 0)),
        out_shape=jax.ShapeDtypeStruct((b, 1), jnp.float32),
        compiler_params=pltpu.CompilerParams(
            dimension_semantics=("parallel",),
            vmem_limit_bytes=48 * 1024 * 1024,
        ),
    )(anchor, positive, negative)

    per_row = losses[:, 0]
    return jnp.mean(per_row) if size_average else jnp.sum(per_row)


def _reference(anchor, positive, negative, margin, size_average=True):
    a = anchor.astype(jnp.float32)
    p = positive.astype(jnp.float32)
    n = negative.astype(jnp.float32)
    dp = jnp.sum((a - p) ** 2, axis=1)
    dn = jnp.sum((a - n) ** 2, axis=1)
    losses = jnp.maximum(dp - dn + margin, 0.0)
    return jnp.mean(losses) if size_average else jnp.sum(losses)


if __name__ == "__main__":
    key = jax.random.PRNGKey(0)
    k1, k2, k3, k4, k5, k6 = jax.random.split(key, 6)

    margin = 1.0

    # Case 1: single tile, f32.
    B, D = 8, 32
    anchor = jax.random.normal(k1, (B, D), dtype=jnp.float32)
    positive = jax.random.normal(k2, (B, D), dtype=jnp.float32)
    negative = jax.random.normal(k3, (B, D), dtype=jnp.float32)

    loss = jax.block_until_ready(triplet_loss(anchor, positive, negative, margin))
    ref = _reference(anchor, positive, negative, margin)
    assert jnp.allclose(loss, ref, rtol=1e-5, atol=1e-6), (loss, ref)

    loss_sum = jax.block_until_ready(
        triplet_loss(anchor, positive, negative, margin, size_average=False))
    ref_sum = _reference(anchor, positive, negative, margin, size_average=False)
    assert jnp.allclose(loss_sum, ref_sum, rtol=1e-5, atol=1e-6), (loss_sum, ref_sum)

    # Case 2: multi-tile + ragged last block (no wrapper padding): B=20 with
    # TILE_B forced to 8 -> grid of 3, last block's OOB output rows dropped.
    B2 = 20
    a2 = jax.random.normal(k4, (B2, D), dtype=jnp.float32)
    p2 = jax.random.normal(k5, (B2, D), dtype=jnp.float32)
    n2 = jax.random.normal(k6, (B2, D), dtype=jnp.float32)

    loss2 = jax.block_until_ready(
        triplet_loss(a2, p2, n2, margin, max_tile_b=8))
    ref2 = _reference(a2, p2, n2, margin)
    assert jnp.allclose(loss2, ref2, rtol=1e-5, atol=1e-6), (loss2, ref2)

    # Case 3: single ragged tile, auto tile sizing (TILE_B = 24 > B2 valid rows).
    loss3 = jax.block_until_ready(triplet_loss(a2, p2, n2, margin))
    assert jnp.allclose(loss3, ref2, rtol=1e-5, atol=1e-6), (loss3, ref2)

    # Case 4: bf16 inputs streamed narrow from HBM, upcast to f32 in-kernel.
    a_bf = a2.astype(jnp.bfloat16)
    p_bf = p2.astype(jnp.bfloat16)
    n_bf = n2.astype(jnp.bfloat16)
    loss4 = jax.block_until_ready(triplet_loss(a_bf, p_bf, n_bf, margin))
    ref4 = _reference(a_bf, p_bf, n_bf, margin)
    assert jnp.allclose(loss4, ref4, rtol=1e-4, atol=1e-5), (loss4, ref4)

    print("KERNEL_OK")
</pallas_src>

<mosaic_0001>
module attributes {stable_mosaic.version = 11 : i64} {
  func.func @_triplet_kernel(%arg0: i32, %arg1: memref<8x32xf32, #tpu.memory_space<vmem>>, %arg2: memref<8x32xf32, #tpu.memory_space<vmem>>, %arg3: memref<8x32xf32, #tpu.memory_space<vmem>>, %arg4: memref<8x1xf32, #tpu.memory_space<vmem>>) attributes {dimension_semantics = [#tpu.dimension_semantics<parallel>], iteration_bounds = array<i64: 1>, scalar_prefetch = 0 : i64, scratch_operands = 0 : i64, tpu.core_type = #tpu.core_type<tc>, window_params = [{transform_indices = @transform_0, window_bounds = array<i64: 8, 32>}, {transform_indices = @transform_1, window_bounds = array<i64: 8, 32>}, {transform_indices = @transform_2, window_bounds = array<i64: 8, 32>}, {transform_indices = @transform_3, window_bounds = array<i64: 8, 1>}]} {
    %c0 = arith.constant 0 : index
    %c0_0 = arith.constant 0 : index
    %0 = vector.load %arg1[%c0, %c0_0] : memref<8x32xf32, #tpu.memory_space<vmem>>, vector<8x32xf32>
    %c0_1 = arith.constant 0 : index
    %c0_2 = arith.constant 0 : index
    %1 = vector.load %arg2[%c0_1, %c0_2] : memref<8x32xf32, #tpu.memory_space<vmem>>, vector<8x32xf32>
    %2 = arith.subf %0, %1 : vector<8x32xf32>
    %3 = arith.mulf %2, %2 : vector<8x32xf32>
    %cst = arith.constant dense<0.000000e+00> : vector<8xf32>
    %4 = vector.multi_reduction <add>, %3, %cst [1] : vector<8x32xf32> to vector<8xf32>
    %5 = vector.shape_cast %4 : vector<8xf32> to vector<8x1xf32>
    %c0_3 = arith.constant 0 : index
    %c0_4 = arith.constant 0 : index
    %6 = vector.load %arg3[%c0_3, %c0_4] : memref<8x32xf32, #tpu.memory_space<vmem>>, vector<8x32xf32>
    %7 = arith.subf %0, %6 : vector<8x32xf32>
    %8 = arith.mulf %7, %7 : vector<8x32xf32>
    %cst_5 = arith.constant dense<0.000000e+00> : vector<8xf32>
    %9 = vector.multi_reduction <add>, %8, %cst_5 [1] : vector<8x32xf32> to vector<8xf32>
    %10 = vector.shape_cast %9 : vector<8xf32> to vector<8x1xf32>
    %11 = arith.subf %5, %10 : vector<8x1xf32>
    %cst_6 = arith.constant 1.000000e+00 : f32
    %12 = vector.broadcast %cst_6 : f32 to vector<8x1xf32>
    %13 = arith.addf %11, %12 : vector<8x1xf32>
    %cst_7 = arith.constant 0.000000e+00 : f32
    %14 = vector.broadcast %cst_7 : f32 to vector<8x1xf32>
    %15 = arith.maximumf %13, %14 : vector<8x1xf32>
    %c0_8 = arith.constant 0 : index
    %c0_9 = arith.constant 0 : index
    %16 = vector.load %arg4[%c0_8, %c0_9] : memref<8x1xf32, #tpu.memory_space<vmem>>, vector<8x1xf32>
    tpu.vector_store %arg4[%c0_8, %c0_9], %15 {strides = array<i32>} : memref<8x1xf32, #tpu.memory_space<vmem>>, vector<8x1xf32>,
    return
  }
  func.func @transform_0(%arg0: i32) -> (i32, i32) {
    %c0_i32 = arith.constant 0 : i32
    %c0_i32_0 = arith.constant 0 : i32
    return %arg0, %c0_i32 : i32, i32
  }
  func.func @transform_1(%arg0: i32) -> (i32, i32) {
    %c0_i32 = arith.constant 0 : i32
    %c0_i32_0 = arith.constant 0 : i32
    return %arg0, %c0_i32 : i32, i32
  }
  func.func @transform_2(%arg0: i32) -> (i32, i32) {
    %c0_i32 = arith.constant 0 : i32
    %c0_i32_0 = arith.constant 0 : i32
    return %arg0, %c0_i32 : i32, i32
  }
  func.func @transform_3(%arg0: i32) -> (i32, i32) {
    %c0_i32 = arith.constant 0 : i32
    %c0_i32_0 = arith.constant 0 : i32
    return %arg0, %c0_i32 : i32, i32
  }
}

</mosaic_0001>

<bundles_post_ra>
// kernel: tpu_custom_call.1
= control target key start
LH: loop header
LB: loop body
LE: loop exit
PB: predicated region body
PF: predicated region fallthrough
CT: control target
= control target key end

     0   :  { %8 = vsyncpa [#allocation3], 0  ;;  %s194_s0 = inlined_call_operand.hbm [shape: f32[8,32], index: 0, kind: input, shape index: {}]   ;;  %s195_s1 = inlined_call_operand.hbm [shape: f32[8,32], index: 1, kind: input, shape index: {}]   ;;  %s196_s2 = inlined_call_operand.hbm [shape: f32[8,32], index: 2, kind: input, shape index: {}]   ;;  %s197_s3 = inlined_call_operand.vmem [shape: f32[8,1], index: 3, kind: output, shape index: {}]  }
   0x1   :  { %9 = vsyncpa [#allocation5], 0  ;;  %s26_s14 = sshll.u32 %s195_s1, 4  ;;  %s159_s15 = smov [#allocation4]   ;;  %s27_s14 = int_to_ptr.hbm [resolvable:$true] %s26_s14 }
   0x2   :  { %s28_s16 = sshll.u32 %s159_s15, 4  ;;  %s15_s19 = sshll.u32 %s194_s0, 4  ;;  %s29_s16 = int_to_ptr.vmem [resolvable:$true] %s28_s16  ;;  %s16_s19 = int_to_ptr.hbm [resolvable:$true] %s15_s19 }
   0x3   :  { %31 = dma.hbm_to_vmem [thread:$0]  %s27_s14, 128, %s29_s16, [#allocation5]  }
   0x4   :  { %s160_s20 = smov [#allocation2]   ;;  %s37_s24 = sshll.u32 %s196_s2, 4  ;;  %s38_s24 = int_to_ptr.hbm [resolvable:$true] %s37_s24 }
   0x5   :  { %s17_s21 = sshll.u32 %s160_s20, 4  ;;  %s161_s1 = smov [#allocation6]   ;;  %s18_s21 = int_to_ptr.vmem [resolvable:$true] %s17_s21 }
   0x6   :  { %20 = dma.hbm_to_vmem [thread:$0]  %s16_s19, 128, %s18_s21, [#allocation3]  }
   0x7   :  { %s39_s25 = sshll.u32 %s161_s1, 4  ;;  %s40_s25 = int_to_ptr.vmem [resolvable:$true] %s39_s25 }
   0x8   :  { %42 = dma.hbm_to_vmem [thread:$0]  %s38_s24, 128, %s40_s25, [#allocation5]  }
   0x9   :  { %155 = dma.done.wait [#allocation3], 128  }
   0xa   :  { %156 = vsyncadd [#allocation3], 4294967168 }
   0xb   :  { %157 = dma.done.wait [#allocation5], 256  }
   0xc   :  { %158 = vsyncadd [#allocation5], 4294967040  ;;  %v55_v0 = vld [vmem:[#allocation2] sm:$0xff]  ;;  %v56_v1 = vld [vmem:[#allocation4] sm:$0xff]  ;;  %vm59_vm0 = vcmask 261120   ;;  %vm72_vm1 = vcmask 7168  }
   0xd   :  { %v63_v2 = vld [vmem:[#allocation6] sm:$0xff]  ;;  %v57_v3 = vsub.f32 %v55_v0, %v56_v1 }
   0xe   :  { %v64_v5 = vsub.f32 %v55_v0, %v63_v2 }
   0xf   :  { %v58_v4 = vmul.f32 %v57_v3, %v57_v3 }
  0x10   :  { %v65_v7 = vmul.f32 %v64_v5, %v64_v5 }
  0x11   :  { %v60_v6 = vsel %vm59_vm0, %v58_v4, 0.0 }
  0x12   :  { %61 = vadd.xlane.f32.xlu0 %v60_v6  ;;  %v66_v8 = vsel %vm59_vm0, %v65_v7, 0.0 }
  0x1a   :  { %67 = vadd.xlane.f32.xlu0 %v66_v8 }
  0x85   :  { %v62_v9 = vpop.xlane.xlu0 %61 }
  0x8d   :  { %v68_v10 = vpop.xlane.xlu0 %67 }
  0x8e   :  { %v69_v11 = vsub.f32 %v62_v9, %v68_v10 }
  0x90   :  { %v70_v12 = vadd.f32 1.0, %v69_v11 }
  0x92   :  { %v71_v13 = vmax.f32 %v70_v12, 0.0 }
  0x94   :  { %73 = vst.msk [vmem:[%s197_s3] sm:$0xff] %vm72_vm1, %v71_v13 }
  0x95   :  { %78 = vsyncpa [#allocation3], 1 }
  0x96   :  { %79 = vsyncpa [#allocation5], 1 }

</bundles_post_ra>
